<compile_context>
chip_gen: v5e
topology: v5e:2x2
jax: 0.10.0
libtpu: 0.0.40
codegen_flags: <defaults>
</compile_context>

<pallas_src>
import jax
import jax.numpy as jnp
from jax.experimental import pallas as pl
from jax.experimental.pallas import tpu as pltpu

NODES = 32                  # "nodes" hyper-parameter of ConversionLayer
IN_FEATURES = 160
HIDDEN = NODES * 2          # 64
OUT_FEATURES = NODES        # 32
TM_MAX = 2048               # max batch tile (rows); amortizes per-step overhead
BATCH = 8                   # small demo batch


def _round_up(x, m):
    return ((x + m - 1) // m) * m


def _pick_tm(batch):
    """Batch tile: large enough to amortize ~0.35us/step pipeline overhead,
    small enough to fit comfortably in scoped VMEM on v5e/v6e/v7x, and (for
    large batches) giving >= 2 tiles so both v7x TensorCores get work."""
    if batch <= 32:
        return max(16, _round_up(batch, 16))       # tiny batch: one small tile
    if batch >= 2 * TM_MAX:
        return TM_MAX
    # Split into ~2 tiles (multiple of 16 for bf16 sublane packing).
    return min(TM_MAX, _round_up(-(-batch // 2), 16))


def mlp_kernel(x_ref, w1_ref, w2_ref, w3_ref, w4_ref, w5_ref, b_ref, o_ref):
    # x tile arrives f32 [TM, 160]; cast to bf16 in-kernel (hidden under DMA).
    h = x_ref[...].astype(jnp.bfloat16)

    # Linear(160, 2n) + Dropout(identity, eval) + ReLU
    h = jnp.dot(h, w1_ref[...], preferred_element_type=jnp.float32)
    h = jnp.maximum(h + b_ref[0:1, :HIDDEN], 0.0).astype(jnp.bfloat16)

    # Linear(2n, 2n) + Dropout + ReLU  (x3)
    h = jnp.dot(h, w2_ref[...], preferred_element_type=jnp.float32)
    h = jnp.maximum(h + b_ref[1:2, :HIDDEN], 0.0).astype(jnp.bfloat16)

    h = jnp.dot(h, w3_ref[...], preferred_element_type=jnp.float32)
    h = jnp.maximum(h + b_ref[2:3, :HIDDEN], 0.0).astype(jnp.bfloat16)

    h = jnp.dot(h, w4_ref[...], preferred_element_type=jnp.float32)
    h = jnp.maximum(h + b_ref[3:4, :HIDDEN], 0.0).astype(jnp.bfloat16)

    # Final Linear(2n, n) — no activation; output written unpadded (B, 32) f32.
    out = jnp.dot(h, w5_ref[...], preferred_element_type=jnp.float32)
    out = out + b_ref[4:5, :OUT_FEATURES]
    o_ref[...] = out.astype(o_ref.dtype)


def conversion_layer_forward(x, params, *, tm=None):
    """x: [B, 160] float32.
    params: list of 5 tuples (W [in,out] bf16, b [1,out] f32).
    Returns [B, OUT_FEATURES] float32."""
    B = x.shape[0]
    if tm is None:
        tm = _pick_tm(B)
    num_tiles = pl.cdiv(B, tm)
    pB = num_tiles * tm

    if pB != B:
        x = jnp.pad(x, ((0, pB - B), (0, 0)))

    ws = [w for (w, _) in params]

    # Pack the five bias rows into one resident (8, 128) f32 slab (row i = layer i).
    bias = jnp.zeros((8, 128), jnp.float32)
    for i, (_, b) in enumerate(params):
        bias = bias.at[i, : b.shape[-1]].set(b[0])

    flops = 2 * pB * (IN_FEATURES * HIDDEN + 3 * HIDDEN * HIDDEN + HIDDEN * OUT_FEATURES)
    weight_bytes = sum(int(w.size) * w.dtype.itemsize for w in ws) + int(bias.size) * 4
    bytes_accessed = pB * IN_FEATURES * 4 + pB * OUT_FEATURES * 4 + weight_bytes

    # Constant (0, 0) block index: weights/biases stay resident in VMEM for the
    # whole grid (no per-tile weight re-DMA).
    w_specs = [pl.BlockSpec(w.shape, lambda i: (0, 0)) for w in ws]
    bias_spec = pl.BlockSpec(bias.shape, lambda i: (0, 0))

    out = pl.pallas_call(
        mlp_kernel,
        out_shape=jax.ShapeDtypeStruct((pB, OUT_FEATURES), jnp.float32),
        grid=(num_tiles,),
        in_specs=[pl.BlockSpec((tm, IN_FEATURES), lambda i: (i, 0))] + w_specs + [bias_spec],
        out_specs=pl.BlockSpec((tm, OUT_FEATURES), lambda i: (i, 0)),
        compiler_params=pltpu.CompilerParams(
            dimension_semantics=("parallel",)),  # shard batch tiles across TCs on v7x
        cost_estimate=pl.CostEstimate(
            flops=flops, transcendentals=0, bytes_accessed=bytes_accessed),
    )(x, *ws, bias)

    # Strip batch padding only when it exists (no lane padding to strip anymore).
    return out if pB == B else out[:B]


def init_params(key):
    """PyTorch-default init (U(-1/sqrt(fan_in), 1/sqrt(fan_in))); weights stored
    pre-transposed as [in, out] in bf16; biases [1, out] in f32. No padding."""
    dims = [(IN_FEATURES, HIDDEN),
            (HIDDEN, HIDDEN),
            (HIDDEN, HIDDEN),
            (HIDDEN, HIDDEN),
            (HIDDEN, OUT_FEATURES)]
    params = []
    for (fan_in, fan_out) in dims:
        key, kw, kb = jax.random.split(key, 3)
        bound = 1.0 / jnp.sqrt(float(fan_in))
        w = jax.random.uniform(kw, (fan_in, fan_out), jnp.float32, -bound, bound)
        b = jax.random.uniform(kb, (1, fan_out), jnp.float32, -bound, bound)
        params.append((w.astype(jnp.bfloat16), b.astype(jnp.float32)))
    return params


def reference_forward(x, params):
    """Pure-JAX reference using identical bf16/f32-accumulate numerics."""
    h = x.astype(jnp.bfloat16)
    n = len(params)
    for i, (w, b) in enumerate(params):
        h = jnp.dot(h, w, preferred_element_type=jnp.float32) + b
        if i < n - 1:
            h = jnp.maximum(h, 0.0).astype(jnp.bfloat16)
    return h


if __name__ == "__main__":
    key = jax.random.PRNGKey(0)
    key, kx = jax.random.split(key)
    x = jax.random.normal(kx, (BATCH, IN_FEATURES), jnp.float32)
    params = init_params(key)

    out = conversion_layer_forward(x, params)
    out = jax.block_until_ready(out)

    ref = reference_forward(x, params)
    assert out.shape == (BATCH, OUT_FEATURES), out.shape
    assert jnp.allclose(out, ref, atol=1e-3, rtol=1e-3), "mismatch vs. reference"

    print("KERNEL_OK")
</pallas_src>

<mosaic_0001>
module attributes {stable_mosaic.version = 11 : i64} {
  func.func @mlp_kernel(%arg0: i32, %arg1: memref<16x160xf32, #tpu.memory_space<vmem>>, %arg2: memref<160x64xbf16, #tpu.memory_space<vmem>>, %arg3: memref<64x64xbf16, #tpu.memory_space<vmem>>, %arg4: memref<64x64xbf16, #tpu.memory_space<vmem>>, %arg5: memref<64x64xbf16, #tpu.memory_space<vmem>>, %arg6: memref<64x32xbf16, #tpu.memory_space<vmem>>, %arg7: memref<8x128xf32, #tpu.memory_space<vmem>>, %arg8: memref<16x32xf32, #tpu.memory_space<vmem>>) attributes {dimension_semantics = [#tpu.dimension_semantics<parallel>], iteration_bounds = array<i64: 1>, scalar_prefetch = 0 : i64, scratch_operands = 0 : i64, tpu.core_type = #tpu.core_type<tc>, window_params = [{transform_indices = @transform_0, window_bounds = array<i64: 16, 160>}, {pipeline_mode = #tpu.pipeline_mode<synchronous>, transform_indices = @transform_1, window_bounds = array<i64: 160, 64>}, {pipeline_mode = #tpu.pipeline_mode<synchronous>, transform_indices = @transform_2, window_bounds = array<i64: 64, 64>}, {pipeline_mode = #tpu.pipeline_mode<synchronous>, transform_indices = @transform_3, window_bounds = array<i64: 64, 64>}, {pipeline_mode = #tpu.pipeline_mode<synchronous>, transform_indices = @transform_4, window_bounds = array<i64: 64, 64>}, {pipeline_mode = #tpu.pipeline_mode<synchronous>, transform_indices = @transform_5, window_bounds = array<i64: 64, 32>}, {pipeline_mode = #tpu.pipeline_mode<synchronous>, transform_indices = @transform_6, window_bounds = array<i64: 8, 128>}, {transform_indices = @transform_7, window_bounds = array<i64: 16, 32>}]} {
    %c0 = arith.constant 0 : index
    %c0_0 = arith.constant 0 : index
    %0 = vector.load %arg1[%c0, %c0_0] : memref<16x160xf32, #tpu.memory_space<vmem>>, vector<16x160xf32>
    %1 = arith.truncf %0 : vector<16x160xf32> to vector<16x160xbf16>
    %c0_1 = arith.constant 0 : index
    %c0_2 = arith.constant 0 : index
    %2 = vector.load %arg2[%c0_1, %c0_2] : memref<160x64xbf16, #tpu.memory_space<vmem>>, vector<160x64xbf16>
    %cst = arith.constant dense<0.000000e+00> : vector<16x64xf32>
    %3 = tpu.matmul %1, %2, %cst {dimension_numbers = #tpu.dot_dimension_numbers<[1], [0], [0], [1], [0, 0, 1, 1], [], []>} : vector<16x160xbf16>, vector<160x64xbf16>, vector<16x64xf32> -> vector<16x64xf32>
    %c0_3 = arith.constant 0 : index
    %c0_4 = arith.constant 0 : index
    %4 = vector.load %arg7[%c0_3, %c0_4] : memref<8x128xf32, #tpu.memory_space<vmem>>, vector<1x64xf32>
    %5 = vector.broadcast %4 : vector<1x64xf32> to vector<16x64xf32>
    %6 = arith.addf %3, %5 : vector<16x64xf32>
    %cst_5 = arith.constant 0.000000e+00 : f32
    %7 = vector.broadcast %cst_5 : f32 to vector<16x64xf32>
    %8 = arith.maximumf %6, %7 : vector<16x64xf32>
    %9 = arith.truncf %8 : vector<16x64xf32> to vector<16x64xbf16>
    %c0_6 = arith.constant 0 : index
    %c0_7 = arith.constant 0 : index
    %10 = vector.load %arg3[%c0_6, %c0_7] : memref<64x64xbf16, #tpu.memory_space<vmem>>, vector<64x64xbf16>
    %cst_8 = arith.constant dense<0.000000e+00> : vector<16x64xf32>
    %11 = tpu.matmul %9, %10, %cst_8 {dimension_numbers = #tpu.dot_dimension_numbers<[1], [0], [0], [1], [0, 0, 1, 1], [], []>} : vector<16x64xbf16>, vector<64x64xbf16>, vector<16x64xf32> -> vector<16x64xf32>
    %c1 = arith.constant 1 : index
    %c0_9 = arith.constant 0 : index
    %12 = vector.load %arg7[%c1, %c0_9] : memref<8x128xf32, #tpu.memory_space<vmem>>, vector<1x64xf32>
    %13 = vector.broadcast %12 : vector<1x64xf32> to vector<16x64xf32>
    %14 = arith.addf %11, %13 : vector<16x64xf32>
    %cst_10 = arith.constant 0.000000e+00 : f32
    %15 = vector.broadcast %cst_10 : f32 to vector<16x64xf32>
    %16 = arith.maximumf %14, %15 : vector<16x64xf32>
    %17 = arith.truncf %16 : vector<16x64xf32> to vector<16x64xbf16>
    %c0_11 = arith.constant 0 : index
    %c0_12 = arith.constant 0 : index
    %18 = vector.load %arg4[%c0_11, %c0_12] : memref<64x64xbf16, #tpu.memory_space<vmem>>, vector<64x64xbf16>
    %cst_13 = arith.constant dense<0.000000e+00> : vector<16x64xf32>
    %19 = tpu.matmul %17, %18, %cst_13 {dimension_numbers = #tpu.dot_dimension_numbers<[1], [0], [0], [1], [0, 0, 1, 1], [], []>} : vector<16x64xbf16>, vector<64x64xbf16>, vector<16x64xf32> -> vector<16x64xf32>
    %c2 = arith.constant 2 : index
    %c0_14 = arith.constant 0 : index
    %20 = vector.load %arg7[%c2, %c0_14] : memref<8x128xf32, #tpu.memory_space<vmem>>, vector<1x64xf32>
    %21 = vector.broadcast %20 : vector<1x64xf32> to vector<16x64xf32>
    %22 = arith.addf %19, %21 : vector<16x64xf32>
    %cst_15 = arith.constant 0.000000e+00 : f32
    %23 = vector.broadcast %cst_15 : f32 to vector<16x64xf32>
    %24 = arith.maximumf %22, %23 : vector<16x64xf32>
    %25 = arith.truncf %24 : vector<16x64xf32> to vector<16x64xbf16>
    %c0_16 = arith.constant 0 : index
    %c0_17 = arith.constant 0 : index
    %26 = vector.load %arg5[%c0_16, %c0_17] : memref<64x64xbf16, #tpu.memory_space<vmem>>, vector<64x64xbf16>
    %cst_18 = arith.constant dense<0.000000e+00> : vector<16x64xf32>
    %27 = tpu.matmul %25, %26, %cst_18 {dimension_numbers = #tpu.dot_dimension_numbers<[1], [0], [0], [1], [0, 0, 1, 1], [], []>} : vector<16x64xbf16>, vector<64x64xbf16>, vector<16x64xf32> -> vector<16x64xf32>
    %c3 = arith.constant 3 : index
    %c0_19 = arith.constant 0 : index
    %28 = vector.load %arg7[%c3, %c0_19] : memref<8x128xf32, #tpu.memory_space<vmem>>, vector<1x64xf32>
    %29 = vector.broadcast %28 : vector<1x64xf32> to vector<16x64xf32>
    %30 = arith.addf %27, %29 : vector<16x64xf32>
    %cst_20 = arith.constant 0.000000e+00 : f32
    %31 = vector.broadcast %cst_20 : f32 to vector<16x64xf32>
    %32 = arith.maximumf %30, %31 : vector<16x64xf32>
    %33 = arith.truncf %32 : vector<16x64xf32> to vector<16x64xbf16>
    %c0_21 = arith.constant 0 : index
    %c0_22 = arith.constant 0 : index
    %34 = vector.load %arg6[%c0_21, %c0_22] : memref<64x32xbf16, #tpu.memory_space<vmem>>, vector<64x32xbf16>
    %cst_23 = arith.constant dense<0.000000e+00> : vector<16x32xf32>
    %35 = tpu.matmul %33, %34, %cst_23 {dimension_numbers = #tpu.dot_dimension_numbers<[1], [0], [0], [1], [0, 0, 1, 1], [], []>} : vector<16x64xbf16>, vector<64x32xbf16>, vector<16x32xf32> -> vector<16x32xf32>
    %c4 = arith.constant 4 : index
    %c0_24 = arith.constant 0 : index
    %36 = vector.load %arg7[%c4, %c0_24] : memref<8x128xf32, #tpu.memory_space<vmem>>, vector<1x32xf32>
    %37 = vector.broadcast %36 : vector<1x32xf32> to vector<16x32xf32>
    %38 = arith.addf %35, %37 : vector<16x32xf32>
    %c0_25 = arith.constant 0 : index
    %c0_26 = arith.constant 0 : index
    %39 = vector.load %arg8[%c0_25, %c0_26] : memref<16x32xf32, #tpu.memory_space<vmem>>, vector<16x32xf32>
    tpu.vector_store %arg8[%c0_25, %c0_26], %38 {strides = array<i32>} : memref<16x32xf32, #tpu.memory_space<vmem>>, vector<16x32xf32>,
    return
  }
  func.func @transform_0(%arg0: i32) -> (i32, i32) {
    %c0_i32 = arith.constant 0 : i32
    %c0_i32_0 = arith.constant 0 : i32
    return %arg0, %c0_i32 : i32, i32
  }
  func.func @transform_1(%arg0: i32) -> (i32, i32) {
    %c0_i32 = arith.constant 0 : i32
    %c0_i32_0 = arith.constant 0 : i32
    %c0_i32_1 = arith.constant 0 : i32
    return %c0_i32, %c0_i32_0 : i32, i32
  }
  func.func @transform_2(%arg0: i32) -> (i32, i32) {
    %c0_i32 = arith.constant 0 : i32
    %c0_i32_0 = arith.constant 0 : i32
    %c0_i32_1 = arith.constant 0 : i32
    return %c0_i32, %c0_i32_0 : i32, i32
  }
  func.func @transform_3(%arg0: i32) -> (i32, i32) {
    %c0_i32 = arith.constant 0 : i32
    %c0_i32_0 = arith.constant 0 : i32
    %c0_i32_1 = arith.constant 0 : i32
    return %c0_i32, %c0_i32_0 : i32, i32
  }
  func.func @transform_4(%arg0: i32) -> (i32, i32) {
    %c0_i32 = arith.constant 0 : i32
    %c0_i32_0 = arith.constant 0 : i32
    %c0_i32_1 = arith.constant 0 : i32
    return %c0_i32, %c0_i32_0 : i32, i32
  }
  func.func @transform_5(%arg0: i32) -> (i32, i32) {
    %c0_i32 = arith.constant 0 : i32
    %c0_i32_0 = arith.constant 0 : i32
    %c0_i32_1 = arith.constant 0 : i32
    return %c0_i32, %c0_i32_0 : i32, i32
  }
  func.func @transform_6(%arg0: i32) -> (i32, i32) {
    %c0_i32 = arith.constant 0 : i32
    %c0_i32_0 = arith.constant 0 : i32
    %c0_i32_1 = arith.constant 0 : i32
    return %c0_i32, %c0_i32_0 : i32, i32
  }
  func.func @transform_7(%arg0: i32) -> (i32, i32) {
    %c0_i32 = arith.constant 0 : i32
    %c0_i32_0 = arith.constant 0 : i32
    return %arg0, %c0_i32 : i32, i32
  }
}

</mosaic_0001>

<bundles_post_ra>
// kernel: tpu_custom_call.1
= control target key start
LH: loop header
LB: loop body
LE: loop exit
PB: predicated region body
PF: predicated region fallthrough
CT: control target
= control target key end

     0   :  { %s712_s0 = inlined_call_operand.vmem [shape: f32[16,160], index: 0, kind: input, shape index: {}]   ;;  %s713_s1 = inlined_call_operand.vmem [shape: bf16[160,64], index: 1, kind: input, shape index: {}]   ;;  %s714_s2 = inlined_call_operand.vmem [shape: bf16[64,64], index: 2, kind: input, shape index: {}]   ;;  %s715_s3 = inlined_call_operand.vmem [shape: bf16[64,64], index: 3, kind: input, shape index: {}]   ;;  %s716_s4 = inlined_call_operand.vmem [shape: bf16[64,64], index: 4, kind: input, shape index: {}]   ;;  %s717_s5 = inlined_call_operand.vmem [shape: bf16[64,32], index: 5, kind: input, shape index: {}]   ;;  %s718_s6 = inlined_call_operand.vmem [shape: f32[8,128], index: 6, kind: input, shape index: {}]   ;;  %s719_s7 = inlined_call_operand.hbm [shape: f32[16,32], index: 7, kind: output, shape index: {}]  }
   0x1   :  { %v501_v0 = vld [vmem:[%s713_s1 + $0x38] sm:$0xff]  ;;  %v503_v1 = vld [vmem:[%s713_s1 + $0x48] sm:$0xff]  ;;  %v500_v2 = vld [vmem:[%s713_s1 + $0x30] sm:$0xff] }
   0x2   :  { %120 = vmatpush.bf16.msra.mxu0 %v501_v0  ;;  %140 = vmatpush.bf16.msra.mxu1 %v503_v1  ;;  %v502_v3 = vld [vmem:[%s713_s1 + $0x40] sm:$0xff]  ;;  %v29_v4 = vld [vmem:[%s712_s0 + $0x8] sm:$0xff]  ;;  %v31_v5 = vld [vmem:[%s712_s0 + $0x18] sm:$0xff] }
   0x3   :  { %v499_v6 = vld [vmem:[%s713_s1 + $0x28] sm:$0xff]  ;;  %v33_v7 = vpack.c.bf16 %v31_v5, %v29_v4 }
   0x6   :  { %121 = vmatpush.bf16.msra.mxu0 %v500_v2 }
   0x7   :  { %12 = vsyncpa [#allocation3], 0  ;;  %141 = vmatpush.bf16.msra.mxu1 %v502_v3  ;;  %vm116_vm0 = vcmask 261120   ;;  %v498_v8 = vld [vmem:[%s713_s1 + $0x20] sm:$0xff]  ;;  %v497_v9 = vld [vmem:[%s713_s1 + $0x18] sm:$0xff]  ;;  %vm185_vm1 = vcmask 523264  }
   0x8   :  { %v496_v10 = vld [vmem:[%s713_s1 + $0x10] sm:$0xff]  ;;  %v495_v11 = vld [vmem:[%s713_s1 + $0x8] sm:$0xff]  ;;  %v494_v12 = vld [vmem:[%s713_s1] sm:$0xff]  ;;  %s373_s20 = sshll.u32 %s719_s7, 4  ;;  %s555_s21 = smov 128   ;;  %s374_s20 = int_to_ptr.hbm [resolvable:$true] %s373_s20 }
   0x9   :  { %v28_v13 = vld [vmem:[%s712_s0] sm:$0xff]  ;;  %v30_v14 = vld [vmem:[%s712_s0 + $0x10] sm:$0xff]  ;;  %v507_v16 = vld [vmem:[%s714_s2 + $0x18] sm:$0xff]  ;;  %s556_s22 = smov 8  }
   0xa   :  { %122 = vmatpush.bf16.msra.mxu0 %v499_v6  ;;  %425 = vmatmul.msk.bf16.vlgmr.msra.gmra.mxu1 %vm116_vm0, %v33_v7  ;;  %v32_v15 = vpack.c.bf16 %v30_v14, %v28_v13  ;;  %v506_v17 = vld [vmem:[%s714_s2 + $0x10] sm:$0xff]  ;;  %v505_v18 = vld [vmem:[%s714_s2 + $0x8] sm:$0xff]  ;;  %v504_v19 = vld [vmem:[%s714_s2] sm:$0xff] }
   0xb   :  { %193 = vmatpush.bf16.msra.mxu2 %v507_v16  ;;  %v523_v22 = vld [vmem:[%s718_s6] ss:$0 sm:$0xff]  ;;  %v511_v32 = vld [vmem:[%s715_s3 + $0x18] sm:$0xff]  ;;  %v510_v33 = vld [vmem:[%s715_s3 + $0x10] sm:$0xff] }
   0xc   :  { %247 = vmatpush.bf16.msra.mxu3 %v511_v32  ;;  %v509_v34 = vld [vmem:[%s715_s3 + $0x8] sm:$0xff]  ;;  %v508_v35 = vld [vmem:[%s715_s3] sm:$0xff]  ;;  %v515_v36 = vld [vmem:[%s716_s4 + $0x18] sm:$0xff] }
   0xd   :  { %301 = vmatpush.bf16.msrb.mxu1 %v515_v36  ;;  %v524_v38 = vld [vmem:[%s718_s6 + $0x1] ss:$0 sm:$0xff]  ;;  %v514_v45 = vld [vmem:[%s716_s4 + $0x10] sm:$0xff]  ;;  %v513_v46 = vld [vmem:[%s716_s4 + $0x8] sm:$0xff] }
   0xe   :  { %123 = vmatpush.bf16.msra.mxu0 %v498_v8  ;;  %v512_v47 = vld [vmem:[%s716_s4] sm:$0xff]  ;;  %v519_v48 = vld [vmem:[%s717_s5 + $0x18] sm:$0xff]  ;;  %v518_v57 = vld [vmem:[%s717_s5 + $0x10] sm:$0xff] }
   0xf   :  { %194 = vmatpush.bf16.msra.mxu2 %v506_v17  ;;  %v525_v50 = vld [vmem:[%s718_s6 + $0x2] ss:$0 sm:$0xff]  ;;  %v517_v58 = vld [vmem:[%s717_s5 + $0x8] sm:$0xff]  ;;  %v526_v61 = vld [vmem:[%s718_s6 + $0x3] ss:$0 sm:$0xff] }
  0x10   :  { %248 = vmatpush.bf16.msra.mxu3 %v510_v33  ;;  %v516_v59 = vld [vmem:[%s717_s5] sm:$0xff]  ;;  %s554_s5 = smov [#allocation2]  }
  0x11   :  { %302 = vmatpush.bf16.msrb.mxu1 %v514_v45  ;;  %v527_v4 = vld [vmem:[%s718_s6 + $0x4] ss:$0 sm:$0xff]  ;;  %s371_s17 = sshll.u32 %s554_s5, 4  ;;  %s372_s17 = int_to_ptr.vmem [resolvable:$true] %s371_s17 }
  0x12   :  { %124 = vmatpush.bf16.msra.mxu0 %v497_v9 }
  0x13   :  { %195 = vmatpush.bf16.msra.mxu2 %v505_v18 }
  0x14   :  { %249 = vmatpush.bf16.msra.mxu3 %v509_v34 }
  0x15   :  { %303 = vmatpush.bf16.msrb.mxu1 %v513_v46 }
  0x16   :  { %125 = vmatpush.bf16.msra.mxu0 %v496_v10 }
  0x17   :  { %196 = vmatpush.bf16.msra.mxu2 %v504_v19 }
  0x18   :  { %250 = vmatpush.bf16.msra.mxu3 %v508_v35 }
  0x19   :  { %304 = vmatpush.bf16.msrb.mxu1 %v512_v47 }
  0x1a   :  { %126 = vmatpush.bf16.msra.mxu0 %v495_v11 }
  0x1b   :  { %355 = vmatpush.bf16.msrb.mxu2 %v519_v48 }
  0x1e   :  { %127 = vmatpush.bf16.msra.mxu0 %v494_v12 }
  0x1f   :  { %356 = vmatpush.bf16.msrb.mxu2 %v518_v57 }
  0x21   :  { %128 = vmatmul.bf16.vlgmr.msra.gmra.mxu0 %v32_v15 }
  0x23   :  { %357 = vmatpush.bf16.msrb.mxu2 %v517_v58 }
  0x27   :  { %358 = vmatpush.bf16.msrb.mxu2 %v516_v59 }
  0x87   :  { %v143_v20 = vpop.f32.mrf.mxu1 }
  0x8f   :  { %v145_v27 = vpop.f32.mrf.mxu1 }
  0x9e   :  { %v129_v21 = vpop.f32.mrf.mxu0 }
  0x9f   :  { %v130_v23 = vadd.f32 %v523_v22, %v129_v21 }
  0xa1   :  { %v144_v25 = vadd.f32 %v143_v20, %v130_v23 }
  0xa3   :  { %v148_v29 = vmax.f32 %v144_v25, 0.0 }
  0xa6   :  { %v131_v24 = vpop.f32.mrf.mxu0 }
  0xa7   :  { %v132_v26 = vadd.f32 %v523_v22, %v131_v24 }
  0xa9   :  { %v146_v28 = vadd.f32 %v145_v27, %v132_v26 }
  0xab   :  { %v149_v30 = vmax.f32 %v146_v28, 0.0 }
  0xad   :  { %v150_v31 = vpack.c.bf16 %v149_v30, %v148_v29 }
  0xaf   :  { %442 = vmatmul.msk.bf16.vlgmr.msra.gmra.mxu2 %vm185_vm1, %v150_v31 }
 0x132   :  { %v198_v37 = vpop.f32.mrf.mxu2 }
 0x133   :  { %v199_v39 = vadd.f32 %v524_v38, %v198_v37 }
 0x135   :  { %v203_v42 = vmax.f32 %v199_v39, 0.0 }
 0x13a   :  { %v200_v40 = vpop.f32.mrf.mxu2 }
 0x13b   :  { %v201_v41 = vadd.f32 %v524_v38, %v200_v40 }
 0x13d   :  { %v204_v43 = vmax.f32 %v201_v41, 0.0 }
 0x13f   :  { %v205_v44 = vpack.c.bf16 %v204_v43, %v203_v42 }
 0x141   :  { %459 = vmatmul.msk.bf16.vlgmr.msra.gmra.mxu3 %vm185_vm1, %v205_v44 }
 0x1c4   :  { %v252_v49 = vpop.f32.mrf.mxu3 }
 0x1c5   :  { %v253_v51 = vadd.f32 %v525_v50, %v252_v49 }
 0x1c7   :  { %v257_v54 = vmax.f32 %v253_v51, 0.0 }
 0x1cc   :  { %v254_v52 = vpop.f32.mrf.mxu3 }
 0x1cd   :  { %v255_v53 = vadd.f32 %v525_v50, %v254_v52 }
 0x1cf   :  { %v258_v55 = vmax.f32 %v255_v53, 0.0 }
 0x1d1   :  { %v259_v56 = vpack.c.bf16 %v258_v55, %v257_v54 }
 0x1d3   :  { %476 = vmatmul.msk.bf16.vlgmr.msrb.gmra.mxu1 %vm185_vm1, %v259_v56 }
 0x250   :  { %v306_v60 = vpop.f32.mrf.mxu1 }
 0x251   :  { %v307_v62 = vadd.f32 %v526_v61, %v306_v60 }
 0x253   :  { %v311_v1 = vmax.f32 %v307_v62, 0.0 }
 0x258   :  { %v308_v63 = vpop.f32.mrf.mxu1 }
 0x259   :  { %v309_v0 = vadd.f32 %v526_v61, %v308_v63 }
 0x25b   :  { %v312_v2 = vmax.f32 %v309_v0, 0.0 }
 0x25d   :  { %v313_v3 = vpack.c.bf16 %v312_v2, %v311_v1 }
 0x25f   :  { %493 = vmatmul.msk.bf16.vlgmr.msrb.gmra.mxu2 %vm185_vm1, %v313_v3 }
 0x2e2   :  { %v360_v5 = vpop.f32.mrf.mxu2 }
 0x2e3   :  { %v361_v6 = vadd.f32 %v527_v4, %v360_v5 }
 0x2e5   :  { %365 = vst.msk [vmem:[#allocation2] sm:$0xff] %vm116_vm0, %v361_v6 }
 0x2ea   :  { %v362_v7 = vpop.f32.mrf.mxu2 }
 0x2eb   :  { %v363_v8 = vadd.f32 %v527_v4, %v362_v7 }
 0x2ed   :  { %366 = vst.msk [vmem:[#allocation2 + $0x8] sm:$0xff] %vm116_vm0, %v363_v8 }
 0x2ee   :  { %379 = dma.vmem_to_hbm [thread:$0]  %s372_s17, 256, %s374_s20, [#allocation3], %s555_s21, %s555_s21, %s556_s22  }
 0x2ef   :  { %552 = dma.done.wait [#allocation3], 256  }
 0x2f0   :  { %553 = vsyncadd [#allocation3], 4294967040 }
 0x2f1   :  { %384 = vsyncpa [#allocation3], 1 }

</bundles_post_ra>
